<compile_context>
chip_gen: v5e
topology: v5e:2x2
jax: 0.10.0
libtpu: 0.0.40
codegen_flags: <defaults>
</compile_context>

<pallas_src>
import functools

import jax
import jax.numpy as jnp
import numpy as np
from jax.experimental import pallas as pl
from jax.experimental.pallas import tpu as pltpu

LANE = 128
TILE_R_MAX = 256  # up to 256*128 cells / tile (~6.9 MiB f32 input per tile)


def _round_up(x, m):
    return (x + m - 1) // m * m


def _yolo_loss_kernel(pred_ref, tbox_ref, tcls_ref, obj_ref, out_ref, *, inv_S):
    """Channel-major planes, cells on (sublane, lane) = (TILE_R, 128).

    pred_ref : (30, T, 128)  box1(x,y,w,h,c) | box2(x,y,w,h,c) | 20 class scores
    tbox_ref : ( 4, T, 128)  target box (x, y, w, h)
    tcls_ref : (20, T, 128)  target class scores
    obj_ref  : ( 1, T, 128)  has-object mask (1.0 / 0.0)
    out_ref  : ( 8, 128)     lane partials: rows 0..3 = cls / noobj / reg / conf
    """
    f32 = lambda v: v.astype(jnp.float32)
    p = lambda c: f32(pred_ref[c])                   # (T, 128), fully dense
    t = lambda c: f32(tbox_ref[c])

    obj = f32(obj_ref[0])
    is_obj = obj > 0.0
    noobj = 1.0 - obj

    # ---- classification loss (object cells only) ----
    dcls = f32(pred_ref[10:30]) - f32(tcls_ref[...])          # (20, T, 128)
    cls_part = jnp.sum(dcls * dcls, axis=0) * obj             # (T, 128)

    # ---- no-object confidence loss (both boxes, non-object cells) ----
    c1 = p(4)
    c2 = p(9)
    noobj_part = (c1 * c1 + c2 * c2) * noobj

    # ---- per-cell IoU of both predicted boxes against the target box ----
    tx, ty, tw, th = t(0), t(1), t(2), t(3)
    t_x1 = tx * inv_S - 0.5 * tw
    t_y1 = ty * inv_S - 0.5 * th
    t_x2 = tx * inv_S + 0.5 * tw
    t_y2 = ty * inv_S + 0.5 * th
    a_t = (t_x2 - t_x1) * (t_y2 - t_y1)                       # hoisted: once per tile

    def box_iou(bx, by, bw, bh):
        p_x1 = bx * inv_S - 0.5 * bw
        p_y1 = by * inv_S - 0.5 * bh
        p_x2 = bx * inv_S + 0.5 * bw
        p_y2 = by * inv_S + 0.5 * bh
        iw = jnp.maximum(jnp.minimum(p_x2, t_x2) - jnp.maximum(p_x1, t_x1), 0.0)
        ih = jnp.maximum(jnp.minimum(p_y2, t_y2) - jnp.maximum(p_y1, t_y1), 0.0)
        inter = iw * ih
        a_p = (p_x2 - p_x1) * (p_y2 - p_y1)
        denom = a_p + a_t - inter
        denom = jnp.where(is_obj, denom, 1.0)                 # avoid 0/0 on masked cells
        return inter / denom                                  # exact div (conf-loss atol)

    b1x, b1y, b1w, b1h = p(0), p(1), p(2), p(3)
    b2x, b2y, b2w, b2h = p(5), p(6), p(7), p(8)
    iou1 = box_iou(b1x, b1y, b1w, b1h)
    iou2 = box_iou(b2x, b2y, b2w, b2h)
    best_iou = jnp.maximum(iou1, iou2)
    # Responsible box: box1 iff iou1 > iou2, else box2 (tie -> box2), exactly
    # matching the `if ious1[i] > ious2[i]` Python loop in the PyTorch module.
    sel1 = iou1 > iou2

    bx = jnp.where(sel1, b1x, b2x)
    by = jnp.where(sel1, b1y, b2y)
    bw = jnp.where(sel1, b1w, b2w)
    bh = jnp.where(sel1, b1h, b2h)
    bconf = jnp.where(sel1, c1, c2)

    # ---- regression loss (xy MSE + sqrt-wh MSE on the responsible box) ----
    # Note: sqrt of negative predicted w/h on OBJECT cells would NaN, exactly as
    # in the PyTorch module; the guard below only protects masked / padded cells.
    safe = lambda v: jnp.where(is_obj, v, 1.0)
    dx = bx - tx
    dy = by - ty
    dw = jnp.sqrt(safe(bw)) - jnp.sqrt(safe(tw))
    dh = jnp.sqrt(safe(bh)) - jnp.sqrt(safe(th))
    reg_part = (dx * dx + dy * dy + dw * dw + dh * dh) * obj

    # ---- containing-object confidence loss (conf vs best IoU) ----
    dc = bconf - best_iou
    conf_part = dc * dc * obj

    # ---- one lane-dense (8,128) store of per-tile lane-wise partial sums ----
    parts = jnp.concatenate(
        [jnp.sum(cls_part, axis=0, keepdims=True),
         jnp.sum(noobj_part, axis=0, keepdims=True),
         jnp.sum(reg_part, axis=0, keepdims=True),
         jnp.sum(conf_part, axis=0, keepdims=True)], axis=0)  # (4, 128)
    out_ref[...] = jnp.concatenate([parts, jnp.zeros_like(parts)], axis=0)


def _to_planes(x, M, R_pad):
    """(M, C) -> channel-major (C, R_pad, 128); pad folds into one relayout."""
    C = x.shape[-1]
    x = jnp.pad(x, ((0, R_pad * LANE - M), (0, 0)))
    return x.T.reshape(C, R_pad, LANE)


def yolo_loss(pred_tensor, target_boxes, target_cls, has_object_map,
              *, S, B, l_coord, l_noobj):
    assert B == 2, "loss hardcodes two boxes per cell (as the PyTorch module does)"
    N = pred_tensor.shape[0]
    M = N * S * S

    # Keep the inputs' native float dtype on the DMA path (bf16 stays bf16 ->
    # half the HBM bytes); the kernel upcasts to f32 after each plane load.
    def as_float(x):
        x = jnp.asarray(x)
        return x if jnp.issubdtype(x.dtype, jnp.floating) else x.astype(jnp.float32)

    pred = as_float(pred_tensor).reshape(M, 5 * B + 20)
    tbox = as_float(target_boxes).reshape(M, 4)
    tcls = as_float(target_cls).reshape(M, 20)
    obj = jnp.asarray(has_object_map).reshape(M, 1).astype(pred.dtype)

    # Tile the cell axis into rows of 128 lanes.  ALIGN=16 keeps the
    # (sublane, lane) block legal for both f32 (8,128) and bf16 (16,128).
    # TILE_R is picked so (a) the "parallel" grid axis has >=2 tiles whenever
    # the data allows it (both TensorCores busy on v7x) and (b) tiles are as
    # large as possible (up to TILE_R_MAX) to amortize per-grid-step overhead.
    R = pl.cdiv(M, LANE)
    ALIGN = 16
    TILE_R = max(ALIGN, min(TILE_R_MAX, _round_up(pl.cdiv(max(R, 1), 2), ALIGN)))
    R_pad = _round_up(max(R, 1), TILE_R)
    num_tiles = R_pad // TILE_R

    pred_p = _to_planes(pred, M, R_pad)
    tbox_p = _to_planes(tbox, M, R_pad)
    tcls_p = _to_planes(tcls, M, R_pad)
    obj_p = _to_planes(obj, M, R_pad)

    # Double-buffered input tiles + headroom for in-kernel temporaries; the
    # explicit limit is needed on v5e (16 MiB scoped default) for big tiles and
    # stays below v7x's 64 MiB physical VMEM.
    in_tile_bytes = TILE_R * LANE * (
        30 * pred.dtype.itemsize + 4 * tbox.dtype.itemsize
        + 20 * tcls.dtype.itemsize + 1 * obj.dtype.itemsize)
    vmem_limit = int(min(2 * in_tile_bytes + (24 << 20), 56 << 20))

    kernel = functools.partial(_yolo_loss_kernel, inv_S=1.0 / float(S))

    partials = pl.pallas_call(
        kernel,
        out_shape=jax.ShapeDtypeStruct((num_tiles * 8, LANE), jnp.float32),
        grid=(num_tiles,),
        in_specs=[
            pl.BlockSpec((30, TILE_R, LANE), lambda i: (0, i, 0)),
            pl.BlockSpec((4, TILE_R, LANE), lambda i: (0, i, 0)),
            pl.BlockSpec((20, TILE_R, LANE), lambda i: (0, i, 0)),
            pl.BlockSpec((1, TILE_R, LANE), lambda i: (0, i, 0)),
        ],
        out_specs=pl.BlockSpec((8, LANE), lambda i: (i, 0)),
        compiler_params=pltpu.CompilerParams(
            dimension_semantics=("parallel",),
            vmem_limit_bytes=vmem_limit),
    )(pred_p, tbox_p, tcls_p, obj_p)

    # tiny final reduction over tiles + lanes in the wrapper
    sums = jnp.sum(partials.reshape(num_tiles, 8, LANE)[:, 0:4, :], axis=(0, 2))

    cls_loss = sums[0]
    no_obj_loss = l_noobj * sums[1]
    reg_loss = l_coord * sums[2]
    contain_loss = sums[3]
    total = cls_loss + no_obj_loss + reg_loss + contain_loss
    return dict(total_loss=total / N,
                reg_loss=reg_loss / N,
                containing_obj_loss=contain_loss / N,
                no_obj_loss=no_obj_loss / N,
                cls_loss=cls_loss / N)


def yolo_loss_ref(pred, tbox, tcls, objmap, *, S, l_coord, l_noobj):
    """NumPy reference mirroring the PyTorch module (boolean-mask gathering)."""
    pred = np.asarray(pred, np.float64)
    tbox = np.asarray(tbox, np.float64)
    tcls = np.asarray(tcls, np.float64)
    obj = np.asarray(objmap, bool)
    N = pred.shape[0]

    b1 = pred[..., :5]
    b2 = pred[..., 5:10]
    pcls = pred[..., 10:]

    cls_loss = ((pcls[obj] - tcls[obj]) ** 2).sum()
    no_obj = ~obj
    noobj_loss = l_noobj * ((b1[no_obj][:, 4] ** 2).sum() + (b2[no_obj][:, 4] ** 2).sum())

    s1, s2, tb = b1[obj], b2[obj], tbox[obj]

    def xyxy(b):
        out = np.zeros((b.shape[0], 4))
        out[:, 0] = b[:, 0] / S - 0.5 * b[:, 2]
        out[:, 1] = b[:, 1] / S - 0.5 * b[:, 3]
        out[:, 2] = b[:, 0] / S + 0.5 * b[:, 2]
        out[:, 3] = b[:, 1] / S + 0.5 * b[:, 3]
        return out

    def diag_iou(p, t):
        lt = np.maximum(p[:, :2], t[:, :2])
        rb = np.minimum(p[:, 2:], t[:, 2:])
        wh = np.clip(rb - lt, 0.0, None)
        inter = wh[:, 0] * wh[:, 1]
        a1 = (p[:, 2] - p[:, 0]) * (p[:, 3] - p[:, 1])
        a2 = (t[:, 2] - t[:, 0]) * (t[:, 3] - t[:, 1])
        return inter / (a1 + a2 - inter)

    txyxy = xyxy(tb)
    i1 = diag_iou(xyxy(s1[:, :4]), txyxy)
    i2 = diag_iou(xyxy(s2[:, :4]), txyxy)
    best_iou = np.maximum(i1, i2)
    best = np.where((i1 > i2)[:, None], s1, s2)

    reg = l_coord * (((best[:, :2] - tb[:, :2]) ** 2).sum()
                     + ((np.sqrt(best[:, 2:4]) - np.sqrt(tb[:, 2:4])) ** 2).sum())
    conf = ((best[:, 4] - best_iou) ** 2).sum()
    total = cls_loss + noobj_loss + reg + conf
    return dict(total_loss=total / N, reg_loss=reg / N, containing_obj_loss=conf / N,
                no_obj_loss=noobj_loss / N, cls_loss=cls_loss / N)


def _make_inputs(key, N, S, B):
    k1, k2, k3, k4, k5 = jax.random.split(key, 5)
    # predictions in (0.05, 0.95) so w/h (and their sqrt) are well-defined
    pred_tensor = jax.random.uniform(k1, (N, S, S, 5 * B + 20),
                                     minval=0.05, maxval=0.95, dtype=jnp.float32)
    txy = jax.random.uniform(k2, (N, S, S, 2), minval=0.0, maxval=1.0, dtype=jnp.float32)
    twh = jax.random.uniform(k3, (N, S, S, 2), minval=0.1, maxval=0.9, dtype=jnp.float32)
    target_boxes = jnp.concatenate([txy, twh], axis=-1)
    target_cls = jax.random.uniform(k4, (N, S, S, 20), dtype=jnp.float32)
    has_object_map = jax.random.bernoulli(k5, p=0.3, shape=(N, S, S))
    return pred_tensor, target_boxes, target_cls, has_object_map


if __name__ == "__main__":
    S, B = 7, 2
    l_coord, l_noobj = 5.0, 0.5
    key = jax.random.PRNGKey(0)
    keys = jax.random.split(key, 2)

    # (N=2: single tile) and (N=48: multi-tile / megacore path)
    for N, k in ((2, keys[0]), (48, keys[1])):
        pred_tensor, target_boxes, target_cls, has_object_map = _make_inputs(k, N, S, B)

        out = yolo_loss(pred_tensor, target_boxes, target_cls, has_object_map,
                        S=S, B=B, l_coord=l_coord, l_noobj=l_noobj)
        out = jax.tree_util.tree_map(jax.block_until_ready, out)

        ref = yolo_loss_ref(pred_tensor, target_boxes, target_cls, has_object_map,
                            S=S, l_coord=l_coord, l_noobj=l_noobj)

        for name in ("total_loss", "reg_loss", "containing_obj_loss",
                     "no_obj_loss", "cls_loss"):
            np.testing.assert_allclose(np.asarray(out[name]), ref[name],
                                       rtol=1e-3, atol=1e-4)

    print("KERNEL_OK")
</pallas_src>

<mosaic_0001>
module attributes {stable_mosaic.version = 11 : i64} {
  func.func @_yolo_loss_kernel(%arg0: i32, %arg1: memref<30x16x128xf32, #tpu.memory_space<vmem>>, %arg2: memref<4x16x128xf32, #tpu.memory_space<vmem>>, %arg3: memref<20x16x128xf32, #tpu.memory_space<vmem>>, %arg4: memref<1x16x128xf32, #tpu.memory_space<vmem>>, %arg5: memref<8x128xf32, #tpu.memory_space<vmem>>) attributes {dimension_semantics = [#tpu.dimension_semantics<parallel>], iteration_bounds = array<i64: 1>, scalar_prefetch = 0 : i64, scratch_operands = 0 : i64, tpu.core_type = #tpu.core_type<tc>, window_params = [{transform_indices = @transform_0, window_bounds = array<i64: 30, 16, 128>}, {transform_indices = @transform_1, window_bounds = array<i64: 4, 16, 128>}, {transform_indices = @transform_2, window_bounds = array<i64: 20, 16, 128>}, {transform_indices = @transform_3, window_bounds = array<i64: 1, 16, 128>}, {transform_indices = @transform_4, window_bounds = array<i64: 8, 128>}]} {
    %c0 = arith.constant 0 : index
    %c0_0 = arith.constant 0 : index
    %c0_1 = arith.constant 0 : index
    %0 = vector.load %arg4[%c0, %c0_0, %c0_1] : memref<1x16x128xf32, #tpu.memory_space<vmem>>, vector<1x16x128xf32>
    %1 = vector.shape_cast %0 : vector<1x16x128xf32> to vector<16x128xf32>
    %cst = arith.constant 0.000000e+00 : f32
    %2 = vector.broadcast %cst : f32 to vector<16x128xf32>
    %3 = arith.cmpf ogt, %1, %2 : vector<16x128xf32>
    %cst_2 = arith.constant 1.000000e+00 : f32
    %4 = vector.broadcast %cst_2 : f32 to vector<16x128xf32>
    %5 = arith.subf %4, %1 : vector<16x128xf32>
    %c10 = arith.constant 10 : index
    %c0_3 = arith.constant 0 : index
    %c0_4 = arith.constant 0 : index
    %6 = vector.load %arg1[%c10, %c0_3, %c0_4] : memref<30x16x128xf32, #tpu.memory_space<vmem>>, vector<20x16x128xf32>
    %c0_5 = arith.constant 0 : index
    %c0_6 = arith.constant 0 : index
    %c0_7 = arith.constant 0 : index
    %7 = vector.load %arg3[%c0_5, %c0_6, %c0_7] : memref<20x16x128xf32, #tpu.memory_space<vmem>>, vector<20x16x128xf32>
    %8 = arith.subf %6, %7 : vector<20x16x128xf32>
    %9 = arith.mulf %8, %8 : vector<20x16x128xf32>
    %cst_8 = arith.constant dense<0.000000e+00> : vector<16x128xf32>
    %10 = vector.multi_reduction <add>, %9, %cst_8 [0] : vector<20x16x128xf32> to vector<16x128xf32>
    %11 = arith.mulf %10, %1 : vector<16x128xf32>
    %c4 = arith.constant 4 : index
    %c0_9 = arith.constant 0 : index
    %c0_10 = arith.constant 0 : index
    %12 = vector.load %arg1[%c4, %c0_9, %c0_10] : memref<30x16x128xf32, #tpu.memory_space<vmem>>, vector<1x16x128xf32>
    %13 = vector.shape_cast %12 : vector<1x16x128xf32> to vector<16x128xf32>
    %c9 = arith.constant 9 : index
    %c0_11 = arith.constant 0 : index
    %c0_12 = arith.constant 0 : index
    %14 = vector.load %arg1[%c9, %c0_11, %c0_12] : memref<30x16x128xf32, #tpu.memory_space<vmem>>, vector<1x16x128xf32>
    %15 = vector.shape_cast %14 : vector<1x16x128xf32> to vector<16x128xf32>
    %16 = arith.mulf %13, %13 : vector<16x128xf32>
    %17 = arith.mulf %15, %15 : vector<16x128xf32>
    %18 = arith.addf %16, %17 : vector<16x128xf32>
    %19 = arith.mulf %18, %5 : vector<16x128xf32>
    %c0_13 = arith.constant 0 : index
    %c0_14 = arith.constant 0 : index
    %c0_15 = arith.constant 0 : index
    %20 = vector.load %arg2[%c0_13, %c0_14, %c0_15] : memref<4x16x128xf32, #tpu.memory_space<vmem>>, vector<1x16x128xf32>
    %21 = vector.shape_cast %20 : vector<1x16x128xf32> to vector<16x128xf32>
    %c1 = arith.constant 1 : index
    %c0_16 = arith.constant 0 : index
    %c0_17 = arith.constant 0 : index
    %22 = vector.load %arg2[%c1, %c0_16, %c0_17] : memref<4x16x128xf32, #tpu.memory_space<vmem>>, vector<1x16x128xf32>
    %23 = vector.shape_cast %22 : vector<1x16x128xf32> to vector<16x128xf32>
    %c2 = arith.constant 2 : index
    %c0_18 = arith.constant 0 : index
    %c0_19 = arith.constant 0 : index
    %24 = vector.load %arg2[%c2, %c0_18, %c0_19] : memref<4x16x128xf32, #tpu.memory_space<vmem>>, vector<1x16x128xf32>
    %25 = vector.shape_cast %24 : vector<1x16x128xf32> to vector<16x128xf32>
    %c3 = arith.constant 3 : index
    %c0_20 = arith.constant 0 : index
    %c0_21 = arith.constant 0 : index
    %26 = vector.load %arg2[%c3, %c0_20, %c0_21] : memref<4x16x128xf32, #tpu.memory_space<vmem>>, vector<1x16x128xf32>
    %27 = vector.shape_cast %26 : vector<1x16x128xf32> to vector<16x128xf32>
    %cst_22 = arith.constant 0.142857149 : f32
    %28 = vector.broadcast %cst_22 : f32 to vector<16x128xf32>
    %29 = arith.mulf %21, %28 : vector<16x128xf32>
    %cst_23 = arith.constant 5.000000e-01 : f32
    %30 = vector.broadcast %cst_23 : f32 to vector<16x128xf32>
    %31 = arith.mulf %30, %25 : vector<16x128xf32>
    %32 = arith.subf %29, %31 : vector<16x128xf32>
    %cst_24 = arith.constant 0.142857149 : f32
    %33 = vector.broadcast %cst_24 : f32 to vector<16x128xf32>
    %34 = arith.mulf %23, %33 : vector<16x128xf32>
    %cst_25 = arith.constant 5.000000e-01 : f32
    %35 = vector.broadcast %cst_25 : f32 to vector<16x128xf32>
    %36 = arith.mulf %35, %27 : vector<16x128xf32>
    %37 = arith.subf %34, %36 : vector<16x128xf32>
    %cst_26 = arith.constant 0.142857149 : f32
    %38 = vector.broadcast %cst_26 : f32 to vector<16x128xf32>
    %39 = arith.mulf %21, %38 : vector<16x128xf32>
    %cst_27 = arith.constant 5.000000e-01 : f32
    %40 = vector.broadcast %cst_27 : f32 to vector<16x128xf32>
    %41 = arith.mulf %40, %25 : vector<16x128xf32>
    %42 = arith.addf %39, %41 : vector<16x128xf32>
    %cst_28 = arith.constant 0.142857149 : f32
    %43 = vector.broadcast %cst_28 : f32 to vector<16x128xf32>
    %44 = arith.mulf %23, %43 : vector<16x128xf32>
    %cst_29 = arith.constant 5.000000e-01 : f32
    %45 = vector.broadcast %cst_29 : f32 to vector<16x128xf32>
    %46 = arith.mulf %45, %27 : vector<16x128xf32>
    %47 = arith.addf %44, %46 : vector<16x128xf32>
    %48 = arith.subf %42, %32 : vector<16x128xf32>
    %49 = arith.subf %47, %37 : vector<16x128xf32>
    %50 = arith.mulf %48, %49 : vector<16x128xf32>
    %c0_30 = arith.constant 0 : index
    %c0_31 = arith.constant 0 : index
    %c0_32 = arith.constant 0 : index
    %51 = vector.load %arg1[%c0_30, %c0_31, %c0_32] : memref<30x16x128xf32, #tpu.memory_space<vmem>>, vector<1x16x128xf32>
    %52 = vector.shape_cast %51 : vector<1x16x128xf32> to vector<16x128xf32>
    %c1_33 = arith.constant 1 : index
    %c0_34 = arith.constant 0 : index
    %c0_35 = arith.constant 0 : index
    %53 = vector.load %arg1[%c1_33, %c0_34, %c0_35] : memref<30x16x128xf32, #tpu.memory_space<vmem>>, vector<1x16x128xf32>
    %54 = vector.shape_cast %53 : vector<1x16x128xf32> to vector<16x128xf32>
    %c2_36 = arith.constant 2 : index
    %c0_37 = arith.constant 0 : index
    %c0_38 = arith.constant 0 : index
    %55 = vector.load %arg1[%c2_36, %c0_37, %c0_38] : memref<30x16x128xf32, #tpu.memory_space<vmem>>, vector<1x16x128xf32>
    %56 = vector.shape_cast %55 : vector<1x16x128xf32> to vector<16x128xf32>
    %c3_39 = arith.constant 3 : index
    %c0_40 = arith.constant 0 : index
    %c0_41 = arith.constant 0 : index
    %57 = vector.load %arg1[%c3_39, %c0_40, %c0_41] : memref<30x16x128xf32, #tpu.memory_space<vmem>>, vector<1x16x128xf32>
    %58 = vector.shape_cast %57 : vector<1x16x128xf32> to vector<16x128xf32>
    %c5 = arith.constant 5 : index
    %c0_42 = arith.constant 0 : index
    %c0_43 = arith.constant 0 : index
    %59 = vector.load %arg1[%c5, %c0_42, %c0_43] : memref<30x16x128xf32, #tpu.memory_space<vmem>>, vector<1x16x128xf32>
    %60 = vector.shape_cast %59 : vector<1x16x128xf32> to vector<16x128xf32>
    %c6 = arith.constant 6 : index
    %c0_44 = arith.constant 0 : index
    %c0_45 = arith.constant 0 : index
    %61 = vector.load %arg1[%c6, %c0_44, %c0_45] : memref<30x16x128xf32, #tpu.memory_space<vmem>>, vector<1x16x128xf32>
    %62 = vector.shape_cast %61 : vector<1x16x128xf32> to vector<16x128xf32>
    %c7 = arith.constant 7 : index
    %c0_46 = arith.constant 0 : index
    %c0_47 = arith.constant 0 : index
    %63 = vector.load %arg1[%c7, %c0_46, %c0_47] : memref<30x16x128xf32, #tpu.memory_space<vmem>>, vector<1x16x128xf32>
    %64 = vector.shape_cast %63 : vector<1x16x128xf32> to vector<16x128xf32>
    %c8 = arith.constant 8 : index
    %c0_48 = arith.constant 0 : index
    %c0_49 = arith.constant 0 : index
    %65 = vector.load %arg1[%c8, %c0_48, %c0_49] : memref<30x16x128xf32, #tpu.memory_space<vmem>>, vector<1x16x128xf32>
    %66 = vector.shape_cast %65 : vector<1x16x128xf32> to vector<16x128xf32>
    %cst_50 = arith.constant 0.142857149 : f32
    %67 = vector.broadcast %cst_50 : f32 to vector<16x128xf32>
    %68 = arith.mulf %52, %67 : vector<16x128xf32>
    %cst_51 = arith.constant 5.000000e-01 : f32
    %69 = vector.broadcast %cst_51 : f32 to vector<16x128xf32>
    %70 = arith.mulf %69, %56 : vector<16x128xf32>
    %71 = arith.subf %68, %70 : vector<16x128xf32>
    %cst_52 = arith.constant 0.142857149 : f32
    %72 = vector.broadcast %cst_52 : f32 to vector<16x128xf32>
    %73 = arith.mulf %54, %72 : vector<16x128xf32>
    %cst_53 = arith.constant 5.000000e-01 : f32
    %74 = vector.broadcast %cst_53 : f32 to vector<16x128xf32>
    %75 = arith.mulf %74, %58 : vector<16x128xf32>
    %76 = arith.subf %73, %75 : vector<16x128xf32>
    %cst_54 = arith.constant 0.142857149 : f32
    %77 = vector.broadcast %cst_54 : f32 to vector<16x128xf32>
    %78 = arith.mulf %52, %77 : vector<16x128xf32>
    %cst_55 = arith.constant 5.000000e-01 : f32
    %79 = vector.broadcast %cst_55 : f32 to vector<16x128xf32>
    %80 = arith.mulf %79, %56 : vector<16x128xf32>
    %81 = arith.addf %78, %80 : vector<16x128xf32>
    %cst_56 = arith.constant 0.142857149 : f32
    %82 = vector.broadcast %cst_56 : f32 to vector<16x128xf32>
    %83 = arith.mulf %54, %82 : vector<16x128xf32>
    %cst_57 = arith.constant 5.000000e-01 : f32
    %84 = vector.broadcast %cst_57 : f32 to vector<16x128xf32>
    %85 = arith.mulf %84, %58 : vector<16x128xf32>
    %86 = arith.addf %83, %85 : vector<16x128xf32>
    %87 = arith.minimumf %81, %42 : vector<16x128xf32>
    %88 = arith.maximumf %71, %32 : vector<16x128xf32>
    %89 = arith.subf %87, %88 : vector<16x128xf32>
    %cst_58 = arith.constant 0.000000e+00 : f32
    %90 = vector.broadcast %cst_58 : f32 to vector<16x128xf32>
    %91 = arith.maximumf %89, %90 : vector<16x128xf32>
    %92 = arith.minimumf %86, %47 : vector<16x128xf32>
    %93 = arith.maximumf %76, %37 : vector<16x128xf32>
    %94 = arith.subf %92, %93 : vector<16x128xf32>
    %cst_59 = arith.constant 0.000000e+00 : f32
    %95 = vector.broadcast %cst_59 : f32 to vector<16x128xf32>
    %96 = arith.maximumf %94, %95 : vector<16x128xf32>
    %97 = arith.mulf %91, %96 : vector<16x128xf32>
    %98 = arith.subf %81, %71 : vector<16x128xf32>
    %99 = arith.subf %86, %76 : vector<16x128xf32>
    %100 = arith.mulf %98, %99 : vector<16x128xf32>
    %101 = arith.addf %100, %50 : vector<16x128xf32>
    %102 = arith.subf %101, %97 : vector<16x128xf32>
    %cst_60 = arith.constant 1.000000e+00 : f32
    %103 = vector.broadcast %cst_60 : f32 to vector<16x128xf32>
    %104 = arith.select %3, %102, %103 : vector<16x128xi1>, vector<16x128xf32>
    %105 = arith.divf %97, %104 : vector<16x128xf32>
    %cst_61 = arith.constant 0.142857149 : f32
    %106 = vector.broadcast %cst_61 : f32 to vector<16x128xf32>
    %107 = arith.mulf %60, %106 : vector<16x128xf32>
    %cst_62 = arith.constant 5.000000e-01 : f32
    %108 = vector.broadcast %cst_62 : f32 to vector<16x128xf32>
    %109 = arith.mulf %108, %64 : vector<16x128xf32>
    %110 = arith.subf %107, %109 : vector<16x128xf32>
    %cst_63 = arith.constant 0.142857149 : f32
    %111 = vector.broadcast %cst_63 : f32 to vector<16x128xf32>
    %112 = arith.mulf %62, %111 : vector<16x128xf32>
    %cst_64 = arith.constant 5.000000e-01 : f32
    %113 = vector.broadcast %cst_64 : f32 to vector<16x128xf32>
    %114 = arith.mulf %113, %66 : vector<16x128xf32>
    %115 = arith.subf %112, %114 : vector<16x128xf32>
    %cst_65 = arith.constant 0.142857149 : f32
    %116 = vector.broadcast %cst_65 : f32 to vector<16x128xf32>
    %117 = arith.mulf %60, %116 : vector<16x128xf32>
    %cst_66 = arith.constant 5.000000e-01 : f32
    %118 = vector.broadcast %cst_66 : f32 to vector<16x128xf32>
    %119 = arith.mulf %118, %64 : vector<16x128xf32>
    %120 = arith.addf %117, %119 : vector<16x128xf32>
    %cst_67 = arith.constant 0.142857149 : f32
    %121 = vector.broadcast %cst_67 : f32 to vector<16x128xf32>
    %122 = arith.mulf %62, %121 : vector<16x128xf32>
    %cst_68 = arith.constant 5.000000e-01 : f32
    %123 = vector.broadcast %cst_68 : f32 to vector<16x128xf32>
    %124 = arith.mulf %123, %66 : vector<16x128xf32>
    %125 = arith.addf %122, %124 : vector<16x128xf32>
    %126 = arith.minimumf %120, %42 : vector<16x128xf32>
    %127 = arith.maximumf %110, %32 : vector<16x128xf32>
    %128 = arith.subf %126, %127 : vector<16x128xf32>
    %cst_69 = arith.constant 0.000000e+00 : f32
    %129 = vector.broadcast %cst_69 : f32 to vector<16x128xf32>
    %130 = arith.maximumf %128, %129 : vector<16x128xf32>
    %131 = arith.minimumf %125, %47 : vector<16x128xf32>
    %132 = arith.maximumf %115, %37 : vector<16x128xf32>
    %133 = arith.subf %131, %132 : vector<16x128xf32>
    %cst_70 = arith.constant 0.000000e+00 : f32
    %134 = vector.broadcast %cst_70 : f32 to vector<16x128xf32>
    %135 = arith.maximumf %133, %134 : vector<16x128xf32>
    %136 = arith.mulf %130, %135 : vector<16x128xf32>
    %137 = arith.subf %120, %110 : vector<16x128xf32>
    %138 = arith.subf %125, %115 : vector<16x128xf32>
    %139 = arith.mulf %137, %138 : vector<16x128xf32>
    %140 = arith.addf %139, %50 : vector<16x128xf32>
    %141 = arith.subf %140, %136 : vector<16x128xf32>
    %cst_71 = arith.constant 1.000000e+00 : f32
    %142 = vector.broadcast %cst_71 : f32 to vector<16x128xf32>
    %143 = arith.select %3, %141, %142 : vector<16x128xi1>, vector<16x128xf32>
    %144 = arith.divf %136, %143 : vector<16x128xf32>
    %145 = arith.maximumf %105, %144 : vector<16x128xf32>
    %146 = arith.cmpf ogt, %105, %144 : vector<16x128xf32>
    %147 = arith.select %146, %52, %60 : vector<16x128xi1>, vector<16x128xf32>
    %148 = arith.select %146, %54, %62 : vector<16x128xi1>, vector<16x128xf32>
    %149 = arith.select %146, %56, %64 : vector<16x128xi1>, vector<16x128xf32>
    %150 = arith.select %146, %58, %66 : vector<16x128xi1>, vector<16x128xf32>
    %151 = arith.select %146, %13, %15 : vector<16x128xi1>, vector<16x128xf32>
    %152 = arith.subf %147, %21 : vector<16x128xf32>
    %153 = arith.subf %148, %23 : vector<16x128xf32>
    %cst_72 = arith.constant 1.000000e+00 : f32
    %154 = vector.broadcast %cst_72 : f32 to vector<16x128xf32>
    %155 = arith.select %3, %149, %154 : vector<16x128xi1>, vector<16x128xf32>
    %156 = math.sqrt %155 : vector<16x128xf32>
    %cst_73 = arith.constant 1.000000e+00 : f32
    %157 = vector.broadcast %cst_73 : f32 to vector<16x128xf32>
    %158 = arith.select %3, %25, %157 : vector<16x128xi1>, vector<16x128xf32>
    %159 = math.sqrt %158 : vector<16x128xf32>
    %160 = arith.subf %156, %159 : vector<16x128xf32>
    %cst_74 = arith.constant 1.000000e+00 : f32
    %161 = vector.broadcast %cst_74 : f32 to vector<16x128xf32>
    %162 = arith.select %3, %150, %161 : vector<16x128xi1>, vector<16x128xf32>
    %163 = math.sqrt %162 : vector<16x128xf32>
    %cst_75 = arith.constant 1.000000e+00 : f32
    %164 = vector.broadcast %cst_75 : f32 to vector<16x128xf32>
    %165 = arith.select %3, %27, %164 : vector<16x128xi1>, vector<16x128xf32>
    %166 = math.sqrt %165 : vector<16x128xf32>
    %167 = arith.subf %163, %166 : vector<16x128xf32>
    %168 = arith.mulf %152, %152 : vector<16x128xf32>
    %169 = arith.mulf %153, %153 : vector<16x128xf32>
    %170 = arith.addf %168, %169 : vector<16x128xf32>
    %171 = arith.mulf %160, %160 : vector<16x128xf32>
    %172 = arith.addf %170, %171 : vector<16x128xf32>
    %173 = arith.mulf %167, %167 : vector<16x128xf32>
    %174 = arith.addf %172, %173 : vector<16x128xf32>
    %175 = arith.mulf %174, %1 : vector<16x128xf32>
    %176 = arith.subf %151, %145 : vector<16x128xf32>
    %177 = arith.mulf %176, %176 : vector<16x128xf32>
    %178 = arith.mulf %177, %1 : vector<16x128xf32>
    %cst_76 = arith.constant dense<0.000000e+00> : vector<128xf32>
    %179 = vector.multi_reduction <add>, %11, %cst_76 [0] : vector<16x128xf32> to vector<128xf32>
    %180 = vector.shape_cast %179 : vector<128xf32> to vector<1x128xf32>
    %cst_77 = arith.constant dense<0.000000e+00> : vector<128xf32>
    %181 = vector.multi_reduction <add>, %19, %cst_77 [0] : vector<16x128xf32> to vector<128xf32>
    %182 = vector.shape_cast %181 : vector<128xf32> to vector<1x128xf32>
    %cst_78 = arith.constant dense<0.000000e+00> : vector<128xf32>
    %183 = vector.multi_reduction <add>, %175, %cst_78 [0] : vector<16x128xf32> to vector<128xf32>
    %184 = vector.shape_cast %183 : vector<128xf32> to vector<1x128xf32>
    %cst_79 = arith.constant dense<0.000000e+00> : vector<128xf32>
    %185 = vector.multi_reduction <add>, %178, %cst_79 [0] : vector<16x128xf32> to vector<128xf32>
    %186 = vector.shape_cast %185 : vector<128xf32> to vector<1x128xf32>
    %187 = tpu.concatenate %180, %182, %184, %186 in 0 : vector<1x128xf32>, vector<1x128xf32>, vector<1x128xf32>, vector<1x128xf32> -> vector<4x128xf32>
    %cst_80 = arith.constant 0.000000e+00 : f32
    %188 = vector.broadcast %cst_80 : f32 to vector<4x128xf32>
    %189 = tpu.concatenate %187, %188 in 0 : vector<4x128xf32>, vector<4x128xf32> -> vector<8x128xf32>
    %c0_81 = arith.constant 0 : index
    %c0_82 = arith.constant 0 : index
    %190 = vector.load %arg5[%c0_81, %c0_82] : memref<8x128xf32, #tpu.memory_space<vmem>>, vector<8x128xf32>
    tpu.vector_store %arg5[%c0_81, %c0_82], %189 {strides = array<i32>} : memref<8x128xf32, #tpu.memory_space<vmem>>, vector<8x128xf32>,
    return
  }
  func.func @transform_0(%arg0: i32) -> (i32, i32, i32) {
    %c0_i32 = arith.constant 0 : i32
    %c0_i32_0 = arith.constant 0 : i32
    %c0_i32_1 = arith.constant 0 : i32
    return %c0_i32, %arg0, %c0_i32_0 : i32, i32, i32
  }
  func.func @transform_1(%arg0: i32) -> (i32, i32, i32) {
    %c0_i32 = arith.constant 0 : i32
    %c0_i32_0 = arith.constant 0 : i32
    %c0_i32_1 = arith.constant 0 : i32
    return %c0_i32, %arg0, %c0_i32_0 : i32, i32, i32
  }
  func.func @transform_2(%arg0: i32) -> (i32, i32, i32) {
    %c0_i32 = arith.constant 0 : i32
    %c0_i32_0 = arith.constant 0 : i32
    %c0_i32_1 = arith.constant 0 : i32
    return %c0_i32, %arg0, %c0_i32_0 : i32, i32, i32
  }
  func.func @transform_3(%arg0: i32) -> (i32, i32, i32) {
    %c0_i32 = arith.constant 0 : i32
    %c0_i32_0 = arith.constant 0 : i32
    %c0_i32_1 = arith.constant 0 : i32
    return %c0_i32, %arg0, %c0_i32_0 : i32, i32, i32
  }
  func.func @transform_4(%arg0: i32) -> (i32, i32) {
    %c0_i32 = arith.constant 0 : i32
    %c0_i32_0 = arith.constant 0 : i32
    return %arg0, %c0_i32 : i32, i32
  }
}

</mosaic_0001>

<bundles_post_ra>
// kernel: tpu_custom_call.1
= control target key start
LH: loop header
LB: loop body
LE: loop exit
PB: predicated region body
PF: predicated region fallthrough
CT: control target
= control target key end

     0   :  { %9 = vsyncpa [#allocation3], 0  ;;  %s1494_s0 = inlined_call_operand.hbm [shape: f32[30,16,128], index: 0, kind: input, shape index: {}]   ;;  %s1495_s1 = inlined_call_operand.hbm [shape: f32[4,16,128], index: 1, kind: input, shape index: {}]   ;;  %s1496_s2 = inlined_call_operand.hbm [shape: f32[20,16,128], index: 2, kind: input, shape index: {}]   ;;  %s1497_s3 = inlined_call_operand.hbm [shape: f32[1,16,128], index: 3, kind: input, shape index: {}]   ;;  %s1498_s4 = inlined_call_operand.hbm [shape: f32[8,128], index: 4, kind: output, shape index: {}]  }
   0x1   :  { %10 = vsyncpa [#allocation6], 0 }
   0x2   :  { %11 = vsyncpa [#allocation9], 0 }
   0x3   :  { %12 = vsyncpa [#allocation4], 0  ;;  %s30_s17 = sshll.u32 %s1495_s1, 4  ;;  %s875_s18 = smov [#allocation5]   ;;  %s31_s17 = int_to_ptr.hbm [resolvable:$true] %s30_s17 }
   0x4   :  { %s32_s19 = sshll.u32 %s875_s18, 4  ;;  %s17_s22 = sshll.u32 %s1494_s0, 4  ;;  %s33_s19 = int_to_ptr.vmem [resolvable:$true] %s32_s19  ;;  %s18_s22 = int_to_ptr.hbm [resolvable:$true] %s17_s22 }
   0x5   :  { %s876_s23 = smov 128   ;;  %s877_s24 = smov 8  }
   0x6   :  { %38 = dma.hbm_to_vmem [thread:$0]  %s31_s17, 1024, %s33_s19, [#allocation6], %s876_s23, %s876_s23, %s877_s24  }
   0x7   :  { %s878_s25 = smov [#allocation2]   ;;  %s43_s29 = sshll.u32 %s1496_s2, 4  ;;  %s44_s29 = int_to_ptr.hbm [resolvable:$true] %s43_s29 }
   0x8   :  { %s19_s26 = sshll.u32 %s878_s25, 4  ;;  %s56_s5 = sshll.u32 %s1497_s3, 4  ;;  %s20_s26 = int_to_ptr.vmem [resolvable:$true] %s19_s26  ;;  %s57_s5 = int_to_ptr.hbm [resolvable:$true] %s56_s5 }
   0x9   :  { %25 = dma.hbm_to_vmem [thread:$0]  %s18_s22, 7680, %s20_s26, [#allocation3], %s876_s23, %s876_s23, %s877_s24  }
   0xa   :  { %s879_s6 = smov [#allocation7]   ;;  %s880_s0 = smov [#allocation8]  }
   0xb   :  { %s45_s7 = sshll.u32 %s879_s6, 4  ;;  %s58_s8 = sshll.u32 %s880_s0, 4  ;;  %s46_s7 = int_to_ptr.vmem [resolvable:$true] %s45_s7  ;;  %s59_s8 = int_to_ptr.vmem [resolvable:$true] %s58_s8 }
   0xc   :  { %51 = dma.hbm_to_vmem [thread:$0]  %s44_s29, 5120, %s46_s7, [#allocation6], %s876_s23, %s876_s23, %s877_s24  }
   0xd   :  { %64 = dma.hbm_to_vmem [thread:$0]  %s57_s5, 256, %s59_s8, [#allocation9], %s876_s23, %s876_s23, %s877_s24  }
   0xe   :  { %867 = dma.done.wait [#allocation3], 7680  }
   0xf   :  { %868 = vsyncadd [#allocation3], 4294959616 }
  0x10   :  { %869 = dma.done.wait [#allocation6], 6144  }
  0x11   :  { %870 = vsyncadd [#allocation6], 4294961152 }
  0x12   :  { %871 = dma.done.wait [#allocation9], 256  }
  0x13   :  { %872 = vsyncadd [#allocation9], 4294967040  ;;  %v88_v0 = vld [vmem:[#allocation2 + $0xa0] sm:$0xff]  ;;  %v89_v1 = vld [vmem:[#allocation2 + $0xa8] sm:$0xff]  ;;  %s881_s2 = smov [#allocation10]   ;;  %s702_s11 = sshll.u32 %s1498_s4, 4  ;;  %s703_s11 = int_to_ptr.hbm [resolvable:$true] %s702_s11 }
  0x14   :  { %v90_v2 = vld [vmem:[#allocation2 + $0xb0] sm:$0xff]  ;;  %v128_v3 = vld [vmem:[#allocation7] sm:$0xff]  ;;  %v91_v4 = vld [vmem:[#allocation2 + $0xb8] sm:$0xff]  ;;  %s700_s3 = sshll.u32 %s881_s2, 4  ;;  %s701_s3 = int_to_ptr.vmem [resolvable:$true] %s700_s3 }
  0x15   :  { %v92_v5 = vld [vmem:[#allocation2 + $0xc0] sm:$0xff]  ;;  %v93_v6 = vld [vmem:[#allocation2 + $0xc8] sm:$0xff]  ;;  %v94_v9 = vld [vmem:[#allocation2 + $0xd0] sm:$0xff]  ;;  %v168_v20 = vsub.f32 %v88_v0, %v128_v3 }
  0x16   :  { %v129_v7 = vld [vmem:[#allocation7 + $0x8] sm:$0xff]  ;;  %v919_v8 = vld [vmem:[#allocation8] sm:$0xff]  ;;  %v95_v10 = vld [vmem:[#allocation2 + $0xd8] sm:$0xff] }
  0x17   :  { %v96_v11 = vld [vmem:[#allocation2 + $0xe0] sm:$0xff]  ;;  %v130_v12 = vld [vmem:[#allocation7 + $0x10] sm:$0xff]  ;;  %v921_v13 = vld [vmem:[#allocation8 + $0x8] sm:$0xff]  ;;  %v169_v27 = vsub.f32 %v89_v1, %v129_v7  ;;  %v208_v55 = vmul.f32 %v168_v20, %v168_v20  ;;  %vm83_vm0 = vcmp.gt.f32.partialorder %v919_v8, 0.0 }
  0x18   :  { %v97_v14 = vld [vmem:[#allocation2 + $0xe8] sm:$0xff]  ;;  %v98_v15 = vld [vmem:[#allocation2 + $0xf0] sm:$0xff]  ;;  %v99_v16 = vld [vmem:[#allocation2 + $0xf8] sm:$0xff]  ;;  %v170_v35 = vsub.f32 %v90_v2, %v130_v12  ;;  %vm84_vm1 = vcmp.gt.f32.partialorder %v921_v13, 0.0 }
  0x19   :  { %v131_v17 = vld [vmem:[#allocation7 + $0x18] sm:$0xff]  ;;  %v132_v18 = vld [vmem:[#allocation7 + $0x20] sm:$0xff]  ;;  %v133_v19 = vld [vmem:[#allocation7 + $0x28] sm:$0xff]  ;;  %v209_v1 = vmul.f32 %v169_v27, %v169_v27 }
  0x1a   :  { %v100_v21 = vld [vmem:[#allocation2 + $0x100] sm:$0xff]  ;;  %v101_v22 = vld [vmem:[#allocation2 + $0x108] sm:$0xff]  ;;  %v102_v23 = vld [vmem:[#allocation2 + $0x110] sm:$0xff]  ;;  %v171_v43 = vsub.f32 %v91_v4, %v131_v17  ;;  %v172_v44 = vsub.f32 %v92_v5, %v132_v18  ;;  %v173_v45 = vsub.f32 %v93_v6, %v133_v19  ;;  %v210_v12 = vmul.f32 %v170_v35, %v170_v35 }
  0x1b   :  { %v134_v24 = vld [vmem:[#allocation7 + $0x30] sm:$0xff]  ;;  %v135_v25 = vld [vmem:[#allocation7 + $0x38] sm:$0xff]  ;;  %v136_v26 = vld [vmem:[#allocation7 + $0x40] sm:$0xff] }
  0x1c   :  { %v103_v29 = vld [vmem:[#allocation2 + $0x118] sm:$0xff]  ;;  %v104_v30 = vld [vmem:[#allocation2 + $0x120] sm:$0xff]  ;;  %v105_v31 = vld [vmem:[#allocation2 + $0x128] sm:$0xff]  ;;  %v174_v52 = vsub.f32 %v94_v9, %v134_v24  ;;  %v175_v53 = vsub.f32 %v95_v10, %v135_v25  ;;  %v176_v54 = vsub.f32 %v96_v11, %v136_v26  ;;  %v213_v35 = vmul.f32 %v173_v45, %v173_v45 }
  0x1d   :  { %v137_v32 = vld [vmem:[#allocation7 + $0x48] sm:$0xff]  ;;  %v138_v33 = vld [vmem:[#allocation7 + $0x50] sm:$0xff]  ;;  %v139_v34 = vld [vmem:[#allocation7 + $0x58] sm:$0xff] }
  0x1e   :  { %v106_v37 = vld [vmem:[#allocation2 + $0x130] sm:$0xff]  ;;  %v107_v38 = vld [vmem:[#allocation2 + $0x138] sm:$0xff]  ;;  %v108_v39 = vld [vmem:[#allocation2 + $0x140] sm:$0xff]  ;;  %v177_v62 = vsub.f32 %v97_v14, %v137_v32  ;;  %v178_v63 = vsub.f32 %v98_v15, %v138_v33  ;;  %v179_v0 = vsub.f32 %v99_v16, %v139_v34  ;;  %v211_v14 = vmul.f32 %v171_v43, %v171_v43 }
  0x1f   :  { %v140_v40 = vld [vmem:[#allocation7 + $0x60] sm:$0xff]  ;;  %v141_v41 = vld [vmem:[#allocation7 + $0x68] sm:$0xff]  ;;  %v142_v42 = vld [vmem:[#allocation7 + $0x70] sm:$0xff]  ;;  %v212_v34 = vmul.f32 %v172_v44, %v172_v44  ;;  %v216_v43 = vmul.f32 %v176_v54, %v176_v54 }
  0x20   :  { %v109_v46 = vld [vmem:[#allocation2 + $0x148] sm:$0xff]  ;;  %v110_v47 = vld [vmem:[#allocation2 + $0x150] sm:$0xff]  ;;  %v111_v48 = vld [vmem:[#allocation2 + $0x158] sm:$0xff]  ;;  %v180_v9 = vsub.f32 %v100_v21, %v140_v40  ;;  %v181_v10 = vsub.f32 %v101_v22, %v141_v41  ;;  %v182_v11 = vsub.f32 %v102_v23, %v142_v42  ;;  %v217_v44 = vmul.f32 %v177_v62, %v177_v62 }
  0x21   :  { %v143_v49 = vld [vmem:[#allocation7 + $0x78] sm:$0xff]  ;;  %v144_v50 = vld [vmem:[#allocation7 + $0x80] sm:$0xff]  ;;  %v145_v51 = vld [vmem:[#allocation7 + $0x88] sm:$0xff] }
  0x22   :  { %v112_v56 = vld [vmem:[#allocation2 + $0x160] sm:$0xff]  ;;  %v113_v57 = vld [vmem:[#allocation2 + $0x168] sm:$0xff]  ;;  %v114_v58 = vld [vmem:[#allocation2 + $0x170] sm:$0xff]  ;;  %v183_v20 = vsub.f32 %v103_v29, %v143_v49  ;;  %v184_v24 = vsub.f32 %v104_v30, %v144_v50  ;;  %v185_v25 = vsub.f32 %v105_v31, %v145_v51  ;;  %v214_v31 = vmul.f32 %v174_v52, %v174_v52 }
  0x23   :  { %v146_v59 = vld [vmem:[#allocation7 + $0x90] sm:$0xff]  ;;  %v147_v60 = vld [vmem:[#allocation7 + $0x98] sm:$0xff]  ;;  %v148_v61 = vld [vmem:[#allocation7 + $0xa0] sm:$0xff]  ;;  %v220_v49 = vmul.f32 %v180_v9, %v180_v9  ;;  %v267_v50 = vadd.f32 %v211_v14, %v209_v1 }
  0x24   :  { %v115_v2 = vld [vmem:[#allocation2 + $0x178] sm:$0xff]  ;;  %v116_v3 = vld [vmem:[#allocation2 + $0x180] sm:$0xff]  ;;  %v117_v4 = vld [vmem:[#allocation2 + $0x188] sm:$0xff]  ;;  %v186_v27 = vsub.f32 %v106_v37, %v146_v59  ;;  %v187_v32 = vsub.f32 %v107_v38, %v147_v60  ;;  %v188_v33 = vsub.f32 %v108_v39, %v148_v61  ;;  %v215_v39 = vmul.f32 %v175_v53, %v175_v53 }
  0x25   :  { %v149_v5 = vld [vmem:[#allocation7 + $0xa8] sm:$0xff]  ;;  %v150_v6 = vld [vmem:[#allocation7 + $0xb0] sm:$0xff]  ;;  %v151_v7 = vld [vmem:[#allocation7 + $0xb8] sm:$0xff]  ;;  %v223_v53 = vmul.f32 %v183_v20, %v183_v20  ;;  %v224_v59 = vmul.f32 %v184_v24, %v184_v24  ;;  %v225_v60 = vmul.f32 %v185_v25, %v185_v25  ;;  %v268_v61 = vadd.f32 %v267_v50, %v213_v35 }
  0x26   :  { %v152_v17 = vld [vmem:[#allocation7 + $0xc0] sm:$0xff]  ;;  %v153_v18 = vld [vmem:[#allocation7 + $0xc8] sm:$0xff]  ;;  %v154_v19 = vld [vmem:[#allocation7 + $0xd0] sm:$0xff]  ;;  %v189_v21 = vsub.f32 %v109_v46, %v149_v5  ;;  %v190_v22 = vsub.f32 %v110_v47, %v150_v6  ;;  %v925_v23 = vsub.f32 %v111_v48, %v151_v7  ;;  %v248_v46 = vadd.f32 %v210_v12, %v208_v55 }
  0x27   :  { %v155_v15 = vld [vmem:[#allocation7 + $0xd8] sm:$0xff]  ;;  %v156_v16 = vld [vmem:[#allocation7 + $0xe0] sm:$0xff]  ;;  %v157_v26 = vld [vmem:[#allocation7 + $0xe8] sm:$0xff]  ;;  %v927_v40 = vsub.f32 %v112_v56, %v152_v17  ;;  %v929_v29 = vsub.f32 %v113_v57, %v153_v18  ;;  %v931_v30 = vsub.f32 %v114_v58, %v154_v19  ;;  %v218_v47 = vmul.f32 %v178_v63, %v178_v63 }
  0x28   :  { %v118_v36 = vld [vmem:[#allocation2 + $0x190] sm:$0xff]  ;;  %v933_v41 = vsub.f32 %v115_v2, %v155_v15  ;;  %v935_v37 = vsub.f32 %v116_v3, %v156_v16  ;;  %v937_v38 = vsub.f32 %v117_v4, %v157_v26  ;;  %v941_v45 = vld [vmem:[#allocation5] sm:$0xff]  ;;  %v219_v48 = vmul.f32 %v179_v0, %v179_v0  ;;  %v943_v51 = vld [vmem:[#allocation5 + $0x8] sm:$0xff] }
  0x29   :  { %v158_v28 = vld [vmem:[#allocation7 + $0xf0] sm:$0xff]  ;;  %1516 = vst [vmem:[#allocation15_spill] sm:$0xff] %v941_v45  ;;  %v945_v52 = vld [vmem:[#allocation5 + $0x20] sm:$0xff]  ;;  %v947_v56 = vld [vmem:[#allocation5 + $0x28] sm:$0xff]  ;;  %v221_v57 = vmul.f32 %v181_v10, %v181_v10  ;;  %v222_v58 = vmul.f32 %v182_v11, %v182_v11  ;;  %v313_v63 = vmul.f32 0.14285715, %v941_v45  ;;  %v269_v4 = vadd.f32 %v268_v61, %v215_v39 }
  0x2a   :  { %v939_v42 = vsub.f32 %v118_v36, %v158_v28  ;;  %1517 = vst [vmem:[#allocation16_spill] sm:$0xff] %v943_v51  ;;  %v249_v28 = vadd.f32 %v248_v46, %v212_v34  ;;  %v949_v36 = vld [vmem:[#allocation5 + $0x10] sm:$0xff]  ;;  %v951_v54 = vld [vmem:[#allocation5 + $0x18] sm:$0xff]  ;;  %v314_v1 = vmul.f32 0.14285715, %v943_v51  ;;  %v315_v2 = vmul.f32 0.5, %v945_v52 }
  0x2b   :  { %1518 = vst [vmem:[#allocation17_spill] sm:$0xff] %v949_v36  ;;  %v953_v55 = vld [vmem:[#allocation5 + $0x30] sm:$0xff]  ;;  %v955_v62 = vld [vmem:[#allocation5 + $0x38] sm:$0xff]  ;;  %v316_v3 = vmul.f32 0.5, %v947_v56  ;;  %v319_v5 = vmul.f32 0.14285715, %v949_v36  ;;  %v226_v9 = vmul.f32 %v186_v27, %v186_v27  ;;  %v227_v10 = vmul.f32 %v187_v32, %v187_v32 }
  0x2c   :  { %1519 = vst [vmem:[#allocation18_spill] sm:$0xff] %v951_v54  ;;  %v250_v0 = vadd.f32 %v249_v28, %v214_v31  ;;  %v320_v6 = vmul.f32 0.14285715, %v951_v54  ;;  %v321_v7 = vmul.f32 0.5, %v953_v55  ;;  %v322_v12 = vmul.f32 0.5, %v955_v62  ;;  %v971_v24 = vld [vmem:[#allocation2] sm:$0xff] }
  0x2d   :  { %v965_v17 = vmul.f32 %v188_v33, %v188_v33  ;;  %v967_v18 = vmul.f32 %v189_v21, %v189_v21  ;;  %v969_v19 = vmul.f32 %v190_v22, %v190_v22  ;;  %v270_v20 = vadd.f32 %v269_v4, %v217_v44  ;;  %1520 = vst [vmem:[#allocation19_spill] sm:$0xff] %v971_v24  ;;  %v973_v25 = vld [vmem:[#allocation2 + $0x8] sm:$0xff]  ;;  %v981_v27 = vld [vmem:[#allocation2 + $0x20] sm:$0xff]  ;;  %v991_v35 = vld [vmem:[#allocation2 + $0x10] sm:$0xff] }
  0x2e   :  { %v251_v11 = vadd.f32 %v250_v0, %v216_v43  ;;  %1521 = vst [vmem:[#allocation20_spill] sm:$0xff] %v973_v25  ;;  %v975_v15 = vsub.f32 %v313_v63, %v315_v2  ;;  %v977_v16 = vsub.f32 %v314_v1, %v316_v3  ;;  %v979_v26 = vadd.f32 %v315_v2, %v313_v63  ;;  %v983_v32 = vld [vmem:[#allocation2 + $0x28] sm:$0xff]  ;;  %v993_v31 = vld [vmem:[#allocation2 + $0x18] sm:$0xff] }
  0x2f   :  { %1522 = vst [vmem:[#allocation21_spill] sm:$0xff] %v981_v27  ;;  %v271_v33 = vadd.f32 %v270_v20, %v219_v48  ;;  %v985_v34 = vsub.f32 %v319_v5, %v321_v7  ;;  %v987_v21 = vsub.f32 %v320_v6, %v322_v12  ;;  %v989_v22 = vadd.f32 %v316_v3, %v314_v1  ;;  %v1001_v48 = vld [vmem:[#allocation2 + $0x30] sm:$0xff]  ;;  %v1003_v28 = vld [vmem:[#allocation2 + $0x38] sm:$0xff] }
  0x30   :  { %v252_v14 = vadd.f32 %v251_v11, %v218_v47  ;;  %1523 = vst [vmem:[#allocation22_spill] sm:$0xff] %v983_v32  ;;  %v995_v43 = vadd.f32 %v321_v7, %v319_v5  ;;  %v358_v44 = vmul.f32 0.14285715, %v971_v24  ;;  %v359_v46 = vmul.f32 0.14285715, %v973_v25  ;;  %v160_v25 = vld [vmem:[#allocation7 + $0x100] sm:$0xff] }
  0x31   :  { %1524 = vst [vmem:[#allocation23_spill] sm:$0xff] %v991_v35  ;;  %v272_v47 = vadd.f32 %v271_v33, %v221_v57  ;;  %v999_v50 = vadd.f32 %v322_v12, %v320_v6  ;;  %v360_v61 = vmul.f32 0.5, %v981_v27  ;;  %v361_v63 = vmul.f32 0.5, %v983_v32  ;;  %v121_v27 = vld [vmem:[#allocation2 + $0x1a8] sm:$0xff] }
  0x32   :  { %1525 = vst [vmem:[#allocation24_spill] sm:$0xff] %v993_v31  ;;  %v253_v39 = vadd.f32 %v252_v14, %v220_v49  ;;  %v329_v49 = vsub.f32 %v979_v26, %v975_v15  ;;  %v364_v1 = vmul.f32 0.14285715, %v991_v35  ;;  %v365_v2 = vmul.f32 0.14285715, %v993_v31  ;;  %v120_v35 = vld [vmem:[#allocation2 + $0x1a0] sm:$0xff] }
  0x33   :  { %1526 = vst [vmem:[#allocation25_spill] sm:$0xff] %v1001_v48  ;;  %v273_v3 = vadd.f32 %v272_v47, %v223_v53  ;;  %v330_v57 = vsub.f32 %v989_v22, %v977_v16  ;;  %v362_v4 = vsub.f32 %v358_v44, %v360_v61  ;;  %v363_v5 = vsub.f32 %v359_v46, %v361_v63 }
  0x34   :  { %1527 = vst [vmem:[#allocation26_spill] sm:$0xff] %v1003_v28  ;;  %v254_v0 = vadd.f32 %v253_v39, %v222_v58  ;;  %v366_v7 = vmul.f32 0.5, %v1001_v48  ;;  %v367_v11 = vmul.f32 0.5, %v1003_v28  ;;  %v370_v12 = vadd.f32 %v360_v61, %v358_v44 }
  0x35   :  { %v274_v58 = vadd.f32 %v273_v3, %v225_v60  ;;  %v371_v20 = vadd.f32 %v361_v63, %v359_v46  ;;  %v376_v14 = vmax.f32 %v362_v4, %v975_v15  ;;  %v377_v33 = vmax.f32 %v363_v5, %v977_v16  ;;  %v119_v3 = vld [vmem:[#allocation2 + $0x198] sm:$0xff] }
  0x36   :  { %v255_v6 = vadd.f32 %v254_v0, %v224_v59  ;;  %v331_v53 = vsub.f32 %v995_v43, %v985_v34  ;;  %v368_v39 = vsub.f32 %v364_v1, %v366_v7  ;;  %v369_v47 = vsub.f32 %v365_v2, %v367_v11 }
  0x37   :  { %v372_v54 = vadd.f32 %v366_v7, %v364_v1  ;;  %v373_v51 = vadd.f32 %v367_v11, %v365_v2  ;;  %v374_v59 = vmin.f32 %v370_v12, %v979_v26  ;;  %v375_v0 = vmin.f32 %v371_v20, %v989_v22 }
  0x38   :  { %v256_v36 = vadd.f32 %v255_v6, %v226_v9  ;;  %v332_v60 = vsub.f32 %v999_v50, %v987_v21  ;;  %v384_v46 = vmax.f32 %v368_v39, %v985_v34  ;;  %v385_v61 = vmax.f32 %v369_v47, %v987_v21  ;;  %v159_v6 = vld [vmem:[#allocation7 + $0xf8] sm:$0xff] }
  0x39   :  { %v382_v44 = vmin.f32 %v372_v54, %v995_v43  ;;  %v275_v63 = vadd.f32 %v274_v58, %v227_v10  ;;  %v378_v9 = vsub.f32 %v374_v59, %v376_v14  ;;  %v379_v1 = vsub.f32 %v375_v0, %v377_v33  ;;  %v122_v10 = vld [vmem:[#allocation2 + $0x1b0] sm:$0xff]  ;;  %v161_v58 = vld [vmem:[#allocation7 + $0x108] sm:$0xff] }
  0x3a   :  { %v383_v2 = vmin.f32 %v373_v51, %v999_v50  ;;  %v1029_v7 = vmul.f32 %v331_v53, %v329_v49  ;;  %v392_v45 = vsub.f32 %v370_v12, %v362_v4  ;;  %v393_v31 = vsub.f32 %v371_v20, %v363_v5  ;;  %v123_v49 = vld [vmem:[#allocation2 + $0x1b8] sm:$0xff]  ;;  %v162_v53 = vld [vmem:[#allocation7 + $0x110] sm:$0xff] }
  0x3b   :  { %v386_v11 = vsub.f32 %v382_v44, %v384_v46  ;;  %v257_v24 = vadd.f32 %v256_v36, %v965_v17  ;;  %v380_v28 = vmax.f32 %v378_v9, 0.0  ;;  %v381_v48 = vmax.f32 %v379_v1, 0.0  ;;  %v163_v44 = vld [vmem:[#allocation7 + $0x118] sm:$0xff]  ;;  %v1041_v20 = vld [vmem:[#allocation2 + $0x50] sm:$0xff]  ;;  %v125_v9 = vld [vmem:[#allocation2 + $0x1c8] sm:$0xff] }
  0x3c   :  { %v387_v32 = vsub.f32 %v383_v2, %v385_v61  ;;  %v1032_v14 = vmul.f32 %v332_v60, %v330_v57  ;;  %v394_v59 = vsub.f32 %v372_v54, %v368_v39  ;;  %v395_v0 = vsub.f32 %v373_v51, %v369_v47  ;;  %1528 = vst [vmem:[#allocation27_spill] sm:$0xff] %v1041_v20  ;;  %v1043_v57 = vld [vmem:[#allocation2 + $0x58] sm:$0xff]  ;;  %v1052_v46 = vld [vmem:[#allocation2 + $0x70] sm:$0xff]  ;;  %v1070_v2 = vld [vmem:[#allocation2 + $0x68] sm:$0xff] }
  0x3d   :  { %v388_v33 = vmax.f32 %v386_v11, 0.0  ;;  %v1034_v4 = vsub.f32 %v119_v3, %v159_v6  ;;  %v231_v5 = vmul.f32 %v925_v23, %v925_v23  ;;  %v276_v36 = vadd.f32 %v275_v63, %v967_v18  ;;  %1529 = vst [vmem:[#allocation28_spill] sm:$0xff] %v1043_v57  ;;  %v1054_v18 = vld [vmem:[#allocation2 + $0x78] sm:$0xff]  ;;  %v126_v1 = vld [vmem:[#allocation2 + $0x1d0] sm:$0xff]  ;;  %v1072_v3 = vld [vmem:[#allocation2 + $0x88] sm:$0xff] }
  0x3e   :  { %v389_v17 = vmax.f32 %v387_v32, 0.0  ;;  %v1039_v12 = vsub.f32 %v120_v35, %v160_v25  ;;  %v396_v51 = vmul.f32 %v394_v59, %v392_v45  ;;  %v397_v54 = vmul.f32 %v395_v0, %v393_v31  ;;  %v124_v32 = vld [vmem:[#allocation2 + $0x1c0] sm:$0xff]  ;;  %1531 = vst [vmem:[#allocation30_spill] sm:$0xff] %v1070_v2  ;;  %v166_v59 = vld [vmem:[#allocation7 + $0x130] sm:$0xff] }
  0x3f   :  { %v1045_v60 = vmul.f32 %v388_v33, %v380_v28  ;;  %v1047_v39 = vsub.f32 %v121_v27, %v161_v58  ;;  %v232_v47 = vmul.f32 %v927_v40, %v927_v40  ;;  %v258_v23 = vadd.f32 %v257_v24, %v969_v19  ;;  %v164_v35 = vld [vmem:[#allocation7 + $0x120] sm:$0xff]  ;;  %1532 = vst [vmem:[#allocation31_spill] sm:$0xff] %v1072_v3  ;;  %v127_v58 = vld [vmem:[#allocation2 + $0x1d8] sm:$0xff]  ;;  %v165_v33 = vld [vmem:[#allocation7 + $0x128] sm:$0xff] }
  0x40   :  { %v1056_v25 = vmul.f32 %v389_v17, %v381_v48  ;;  %v202_v61 = vsub.f32 %v122_v10, %v162_v53  ;;  %v1058_v28 = vsub.f32 %v123_v49, %v163_v44  ;;  %v398_v45 = vadd.f32 %v396_v51, %v1029_v7  ;;  %v1064_v19 = vld [vmem:[#allocation2 + $0x60] sm:$0xff] }
  0x41   :  { %v399_v27 = vadd.f32 %v397_v54, %v1032_v14  ;;  %v233_v40 = vmul.f32 %v929_v29, %v929_v29  ;;  %v277_v31 = vadd.f32 %v276_v36, %v231_v5  ;;  %1530 = vst [vmem:[#allocation29_spill] sm:$0xff] %v1064_v19  ;;  %v1066_v24 = vld [vmem:[#allocation2 + $0x80] sm:$0xff]  ;;  %v434_v48 = vmul.f32 0.14285715, %v1041_v20  ;;  %v167_v5 = vld [vmem:[#allocation7 + $0x138] sm:$0xff] }
  0x42   :  { %v435_v63 = vmul.f32 0.14285715, %v1043_v57  ;;  %v400_v6 = vsub.f32 %v398_v45, %v1045_v60  ;;  %v436_v29 = vmul.f32 0.5, %v1052_v46  ;;  %v437_v10 = vmul.f32 0.5, %v1054_v18 }
  0x43   :  { %v401_v11 = vsub.f32 %v399_v27, %v1056_v25  ;;  %v204_v0 = vsub.f32 %v124_v32, %v164_v35  ;;  %v234_v49 = vmul.f32 %v931_v30, %v931_v30  ;;  %v235_v53 = vmul.f32 %v933_v41, %v933_v41 }
  0x44   :  { %v259_v44 = vadd.f32 %v258_v23, %v232_v47  ;;  %v1084_v36 = vsel %vm83_vm0, %v400_v6, 1.0  ;;  %v440_v51 = vmul.f32 0.14285715, %v1064_v19  ;;  %v442_v54 = vmul.f32 0.5, %v1066_v24 }
  0x45   :  { %v1088_v17 = vsel %vm84_vm1, %v401_v11, 1.0  ;;  %v278_v32 = vadd.f32 %v277_v31, %v233_v40  ;;  %721 = vrcp.f32 %v1084_v36  ;;  %v441_v30 = vmul.f32 0.14285715, %v1070_v2 }
  0x46   :  { %v443_v41 = vmul.f32 0.5, %v1072_v3  ;;  %723 = vrcp.f32 %v1088_v17  ;;  %v438_v47 = vsub.f32 %v434_v48, %v436_v29  ;;  %v446_v23 = vadd.f32 %v436_v29, %v434_v48 }
  0x47   :  { %v447_v35 = vadd.f32 %v437_v10, %v435_v63  ;;  %v205_v45 = vsub.f32 %v125_v9, %v165_v33  ;;  %v206_v27 = vsub.f32 %v126_v1, %v166_v59  ;;  %v1096_v6 = vsub.f32 %v127_v58, %v167_v5 }
  0x48   :  { %v439_v11 = vsub.f32 %v435_v63, %v437_v10  ;;  %v236_v19 = vmul.f32 %v935_v37, %v935_v37  ;;  %v237_v40 = vmul.f32 %v937_v38, %v937_v38  ;;  %v238_v31 = vmul.f32 %v939_v42, %v939_v42 }
  0x49   :  { %v448_v2 = vadd.f32 %v442_v54, %v440_v51  ;;  %v260_v57 = vadd.f32 %v259_v44, %v234_v49  ;;  %v279_v20 = vadd.f32 %v278_v32, %v235_v53  ;;  %v444_v3 = vsub.f32 %v440_v51, %v442_v54 }
  0x4a   :  { %v449_v48 = vadd.f32 %v443_v41, %v441_v30  ;;  %v445_v29 = vsub.f32 %v441_v30, %v443_v41  ;;  %v450_v9 = vmin.f32 %v446_v23, %v979_v26  ;;  %v451_v1 = vmin.f32 %v447_v35, %v989_v22  ;;  %v1136_v41 = vld [vmem:[#allocation2 + $0x40] sm:$0xff] }
  0x4b   :  { %v452_v63 = vmax.f32 %v438_v47, %v975_v15  ;;  %v1107_v10 = vpop.eup %721  ;;  %v239_v37 = vmul.f32 %v1034_v4, %v1034_v4  ;;  %v240_v38 = vmul.f32 %v1039_v12, %v1039_v12  ;;  %v241_v42 = vmul.f32 %v1047_v39, %v1047_v39 }
  0x4c   :  { %v453_v58 = vmax.f32 %v439_v11, %v977_v16  ;;  %v1116_v33 = vpop.eup %723  ;;  %v1118_v26 = vmul.f32 %v202_v61, %v202_v61  ;;  %v458_v15 = vmin.f32 %v448_v2, %v995_v43  ;;  %v459_v59 = vmin.f32 %v449_v48, %v999_v50 }
  0x4d   :  { %v454_v22 = vsub.f32 %v450_v9, %v452_v63  ;;  %v1124_v4 = vmul.f32 %v1058_v28, %v1058_v28  ;;  %v261_v49 = vadd.f32 %v260_v57, %v236_v19  ;;  %v280_v12 = vadd.f32 %v279_v20, %v237_v40 }
  0x4e   :  { %v455_v53 = vsub.f32 %v451_v1, %v453_v58  ;;  %v1126_v44 = vmul.f32 %v204_v0, %v204_v0  ;;  %v405_v16 = vmul.f32 %v1107_v10, %v1084_v36  ;;  %v460_v39 = vmax.f32 %v444_v3, %v985_v34  ;;  %v1138_v34 = vld [vmem:[#allocation2 + $0x90] sm:$0xff] }
  0x4f   :  { %v461_v61 = vmax.f32 %v445_v29, %v987_v21  ;;  %v420_v43 = vmul.f32 %v1116_v33, %v1088_v17  ;;  %v456_v50 = vmax.f32 %v454_v22, 0.0  ;;  %v468_v5 = vsub.f32 %v446_v23, %v438_v47 }
  0x50   :  { %v469_v51 = vsub.f32 %v447_v35, %v439_v11  ;;  %v457_v28 = vmax.f32 %v455_v53, 0.0  ;;  %v462_v54 = vsub.f32 %v458_v15, %v460_v39  ;;  %v470_v20 = vsub.f32 %v448_v2, %v444_v3 }
  0x51   :  { %v463_v57 = vsub.f32 %v459_v59, %v461_v61  ;;  %v1134_v19 = vmul.f32 %v205_v45, %v205_v45  ;;  %v262_v0 = vadd.f32 %v261_v49, %v238_v31  ;;  %v281_v32 = vadd.f32 %v280_v12, %v239_v37 }
  0x52   :  { %v471_v30 = vsub.f32 %v449_v48, %v445_v29  ;;  %v406_v21 = vsub.f32 1.0, %v405_v16  ;;  %v464_v40 = vmax.f32 %v462_v54, 0.0  ;;  %v472_v1 = vmul.f32 %v470_v20, %v468_v5 }
  0x53   :  { %v465_v9 = vmax.f32 %v463_v57, 0.0  ;;  %v421_v63 = vsub.f32 1.0, %v420_v43  ;;  %v1143_v23 = vsel %vm83_vm0, %v945_v52, 1.0  ;;  %v1148_v2 = vsel %vm84_vm1, %v947_v56, 1.0 }
  0x54   :  { %v473_v47 = vmul.f32 %v471_v30, %v469_v51  ;;  %v1150_v3 = vmul.f32 %v206_v27, %v206_v27  ;;  %v1152_v35 = vmul.f32 %v464_v40, %v456_v50  ;;  %v474_v11 = vadd.f32 %v472_v1, %v1029_v7 }
  0x55   :  { %v1154_v45 = vmul.f32 %v465_v9, %v457_v28  ;;  %v294_v31 = vmul.f32 %v1136_v41, %v1136_v41  ;;  %v296_v52 = vmul.f32 %v1138_v34, %v1138_v34  ;;  %725 = vrsqrt.f32 %v1143_v23 }
  0x56   :  { %v475_v48 = vadd.f32 %v473_v47, %v1032_v14  ;;  %v263_v56 = vadd.f32 %v262_v0, %v240_v38  ;;  %v282_v29 = vadd.f32 %v281_v32, %v241_v42  ;;  %v476_v27 = vsub.f32 %v474_v11, %v1152_v35  ;;  %v1180_v38 = vld [vmem:[#allocation2 + $0x48] sm:$0xff]  ;;  %v1182_v42 = vld [vmem:[#allocation2 + $0x98] sm:$0xff] }
  0x57   :  { %727 = vrsqrt.f32 %v1148_v2  ;;  %v407_v37 = vmul.f32 %v1107_v10, %v406_v21  ;;  %v422_v7 = vmul.f32 %v1116_v33, %v421_v63  ;;  %v1171_v22 = vsel %vm83_vm0, %v953_v55, 1.0 }
  0x58   :  { %v477_v58 = vsub.f32 %v475_v48, %v1154_v45  ;;  %vm409_vm2 = vweird.f32 %v1084_v36  ;;  %vm410_vm3 = vweird.f32 %v1107_v10  ;;  %v1177_v14 = vsel %vm83_vm0, %v476_v27, 1.0 }
  0x59   :  { %729 = vrsqrt.f32 %v1171_v22  ;;  %vm424_vm4 = vweird.f32 %v1088_v17  ;;  %vm425_vm5 = vweird.f32 %v1116_v33  ;;  %v413_v15 = vand.u32 2147483647, %v1084_v36  ;;  %vm1204_vm6 = vmor %vm409_vm2, %vm410_vm3 }
  0x5a   :  { %v1188_v55 = vsel %vm84_vm1, %v477_v58, 1.0  ;;  %731 = vrcp.f32 %v1177_v14  ;;  %v415_v59 = vand.u32 2147483648, %v1084_v36  ;;  %v428_v49 = vand.u32 2147483647, %v1088_v17  ;;  %vm1222_vm7 = vmor %vm424_vm4, %vm425_vm5 }
  0x5b   :  { %733 = vrcp.f32 %v1188_v55  ;;  %v1195_v12 = vpop.eup %725  ;;  %v247_v53 = vmul.f32 %v1096_v6, %v1096_v6  ;;  %v408_v16 = vadd.f32 %v1107_v10, %v407_v37  ;;  %v423_v61 = vadd.f32 %v1116_v33, %v422_v7 }
  0x5c   :  { %v430_v43 = vand.u32 2147483648, %v1088_v17  ;;  %v295_v5 = vmul.f32 %v1180_v38, %v1180_v38  ;;  %v297_v6 = vmul.f32 %v1182_v42, %v1182_v42  ;;  %v1216_v51 = vadd.f32 %v296_v52, %v294_v31 }
  0x5d   :  { %v1210_v50 = vpop.eup %727  ;;  %v557_v28 = vmul.f32 %v1195_v12, %v1143_v23  ;;  %v264_v54 = vadd.f32 %v263_v56, %v1118_v26  ;;  %v283_v57 = vadd.f32 %v282_v29, %v1124_v4  ;;  %v1235_v0 = vsel %vm84_vm1, %v955_v62, 1.0 }
  0x5e   :  { %v569_v20 = vmul.f32 %v1210_v50, %v1148_v2  ;;  %vm1239_vm8 = vcmp.eq.f32.partialorder %v413_v15, 8.507059e+37  ;;  %v416_v30 = vor.u32 1.1754944e-38, %v415_v59  ;;  %vm1243_vm9 = vcmp.eq.f32.partialorder %v428_v49, 8.507059e+37 }
  0x5f   :  { %v1237_v17 = vpop.eup %729  ;;  %v558_v26 = vmul.f32 %v1195_v12, %v557_v28  ;;  %v412_v40 = vsel %vm1204_vm6, %v1107_v10, %v408_v16  ;;  %v427_v62 = vsel %vm1222_vm7, %v1116_v33, %v423_v61  ;;  %v431_v9 = vor.u32 1.1754944e-38, %v430_v43 }
  0x60   :  { %v732_v4 = vpop.eup %731  ;;  %v570_v1 = vmul.f32 %v1210_v50, %v569_v20  ;;  %vm485_vm10 = vweird.f32 %v1177_v14  ;;  %v489_v11 = vand.u32 2147483647, %v1177_v14  ;;  %735 = vrsqrt.f32 %v1235_v0 }
  0x61   :  { %v734_v63 = vpop.eup %733  ;;  %v481_v47 = vmul.f32 %v732_v4, %v1177_v14  ;;  %v491_v31 = vand.u32 2147483648, %v1177_v14  ;;  %vm500_vm11 = vweird.f32 %v1188_v55  ;;  %v504_v33 = vand.u32 2147483647, %v1188_v55 }
  0x62   :  { %v496_v10 = vmul.f32 %v734_v63, %v1188_v55  ;;  %vm486_vm12 = vweird.f32 %v732_v4  ;;  %v506_v48 = vand.u32 2147483648, %v1188_v55  ;;  %v559_v56 = vmul.f32 0.5, %v558_v26 }
  0x63   :  { %v482_v52 = vsub.f32 1.0, %v481_v47  ;;  %vm501_vm13 = vweird.f32 %v734_v63  ;;  %v571_v27 = vmul.f32 0.5, %v570_v1  ;;  %v611_v37 = vmul.f32 %v1237_v17, %v1171_v22  ;;  %vm1274_vm14 = vmor %vm485_vm10, %vm486_vm12 }
  0x64   :  { %v497_v29 = vsub.f32 1.0, %v496_v10  ;;  %v265_v7 = vadd.f32 %v264_v54, %v1126_v44  ;;  %v284_v58 = vadd.f32 %v283_v57, %v1134_v19  ;;  %v299_v15 = vadd.f32 %v297_v6, %v295_v5  ;;  %vm1283_vm2 = vmor %vm500_vm11, %vm501_vm13  ;;  %v1552_v10 = vld [vmem:[#allocation22_spill] sm:$0xff]  ;;  %v1556_v19 = vld [vmem:[#allocation27_spill] sm:$0xff] }
  0x65   :  { %v483_v59 = vmul.f32 %v732_v4, %v482_v52  ;;  %v417_v49 = vsel %vm1239_vm8, %v416_v30, %v412_v40  ;;  %v432_v16 = vsel %vm1243_vm9, %v431_v9, %v427_v62  ;;  %v492_v61 = vor.u32 1.1754944e-38, %v491_v31 }
  0x66   :  { %v498_v43 = vmul.f32 %v734_v63, %v497_v29  ;;  %v1278_v36 = vpop.eup %735  ;;  %vm490_vm15 = vcmp.eq.f32.partialorder %v489_v11, 8.507059e+37  ;;  %v507_v5 = vor.u32 1.1754944e-38, %v506_v48  ;;  %v560_v6 = vsub.f32 1.5, %v559_v56  ;;  %v1551_v11 = vld [vmem:[#allocation21_spill] sm:$0xff]  ;;  %v1554_v29 = vld [vmem:[#allocation31_spill] sm:$0xff] }
  0x67   :  { %v484_v44 = vadd.f32 %v732_v4, %v483_v59  ;;  %vm505_vm3 = vcmp.eq.f32.partialorder %v504_v33, 8.507059e+37  ;;  %v572_v28 = vsub.f32 1.5, %v571_v27  ;;  %v612_v54 = vmul.f32 %v1237_v17, %v611_v37  ;;  %v1553_v48 = vld [vmem:[#allocation25_spill] sm:$0xff]  ;;  %v1555_v27 = vld [vmem:[#allocation26_spill] sm:$0xff] }
  0x68   :  { %v499_v14 = vadd.f32 %v734_v63, %v498_v43  ;;  %v266_v57 = vadd.f32 %v265_v7, %v1150_v3  ;;  %v285_v20 = vadd.f32 %v284_v58, %v247_v53  ;;  %v1290_v32 = vmul.f32 %v417_v49, %v1045_v60 }
  0x69   :  { %v488_v55 = vsel %vm1274_vm14, %v732_v4, %v484_v44  ;;  %v1295_v30 = vmul.f32 %v432_v16, %v1056_v25  ;;  %v623_v40 = vmul.f32 %v1278_v36, %v1235_v0  ;;  %v561_v60 = vmul.f32 %v1195_v12, %v560_v6  ;;  %v1558_v6 = vld [vmem:[#allocation28_spill] sm:$0xff] }
  0x6a   :  { %v493_v21 = vsel %vm490_vm15, %v492_v61, %v488_v55  ;;  %v503_v26 = vsel %vm1283_vm2, %v734_v63, %v499_v14  ;;  %v573_v4 = vmul.f32 %v1210_v50, %v572_v28  ;;  %v613_v9 = vmul.f32 0.5, %v612_v54  ;;  %v1559_v14 = vld [vmem:[#allocation20_spill] sm:$0xff]  ;;  %v1560_v54 = vld [vmem:[#allocation29_spill] sm:$0xff] }
  0x6b   :  { %v1302_v62 = vmul.f32 %v493_v21, %v1152_v35  ;;  %v508_v3 = vsel %vm505_vm3, %v507_v5, %v503_v26  ;;  %v1545_v25 = vsub.f32 1.0, %v919_v8  ;;  %v1546_v63 = vsub.f32 1.0, %v921_v13  ;;  %v1557_v5 = vld [vmem:[#allocation19_spill] sm:$0xff] }
  0x6c   :  { %v509_v53 = vmul.f32 %v508_v3, %v1154_v45  ;;  %v1323_v45 = vmul.f32 %v266_v57, %v919_v8  ;;  %v1326_v12 = vmul.f32 %v285_v20, %v921_v13  ;;  %v562_v52 = vmul.f32 %v561_v60, %v1143_v23  ;;  %v1562_v20 = vld [vmem:[#allocation30_spill] sm:$0xff]  ;;  %v1564_v60 = vld [vmem:[#allocation15_spill] sm:$0xff] }
  0x6d   :  { %v1310_v1 = vmul.f32 %v1216_v51, %v1545_v25  ;;  %v1314_v47 = vmul.f32 %v299_v15, %v1546_v63  ;;  %vm1318_vm4 = vcmp.gt.f32.partialorder %v1290_v32, %v1302_v62  ;;  %v624_v51 = vmul.f32 %v1278_v36, %v623_v40 }
  0x6e   :  { %vm1329_vm5 = vcmp.gt.f32.partialorder %v1295_v30, %v509_v53  ;;  %v518_v31 = vsel %vm1318_vm4, %v1551_v11, %v1052_v46  ;;  %vm563_vm6 = vcmp.eq.f32.partialorder %v1143_v23, inf  ;;  %v520_v56 = vsel %vm1318_vm4, %v1553_v48, %v1066_v24 }
  0x6f   :  { %v519_v33 = vsel %vm1329_vm5, %v1552_v10, %v1054_v18  ;;  %v521_v37 = vsel %vm1329_vm5, %v1555_v27, %v1554_v29  ;;  %v574_v46 = vmul.f32 %v573_v4, %v1148_v2  ;;  %v614_v7 = vsub.f32 1.5, %v613_v9  ;;  %v1565_v4 = vld [vmem:[#allocation16_spill] sm:$0xff]  ;;  %v1567_v9 = vld [vmem:[#allocation18_spill] sm:$0xff] }
  0x70   :  { %vm565_vm7 = vcmp.eq.f32.partialorder %v1143_v23, 0.0  ;;  %v566_v18 = vand.u32 2147483648, %v1143_v23  ;;  %vm575_vm8 = vcmp.eq.f32.partialorder %v1148_v2, inf  ;;  %vm577_vm9 = vcmp.eq.f32.partialorder %v1148_v2, 0.0 }
  0x71   :  { %v1359_v58 = vsel %vm83_vm0, %v518_v31, 1.0  ;;  %v1363_v24 = vsel %vm84_vm1, %v519_v33, 1.0  ;;  %v578_v15 = vand.u32 2147483648, %v1148_v2  ;;  %v1368_v59 = vsel %vm83_vm0, %v520_v56, 1.0 }
  0x72   :  { %737 = vrsqrt.f32 %v1359_v58  ;;  %v564_v49 = vsel %vm563_vm6, %v1143_v23, %v562_v52  ;;  %v1374_v16 = vsel %vm84_vm1, %v521_v37, 1.0  ;;  %vm617_vm10 = vcmp.eq.f32.partialorder %v1171_v22, inf }
  0x73   :  { %739 = vrsqrt.f32 %v1363_v24  ;;  %v576_v39 = vsel %vm575_vm8, %v1148_v2, %v574_v46  ;;  %v615_v61 = vmul.f32 %v1237_v17, %v614_v7  ;;  %v625_v43 = vmul.f32 0.5, %v624_v51  ;;  %v1561_v17 = vld [vmem:[#allocation23_spill] sm:$0xff] }
  0x74   :  { %v510_v8 = vmax.f32 %v1290_v32, %v1302_v62  ;;  %v511_v44 = vmax.f32 %v1295_v30, %v509_v53  ;;  %v514_v13 = vsel %vm1318_vm4, %v1557_v5, %v1556_v19  ;;  %741 = vrsqrt.f32 %v1368_v59  ;;  %v1563_v32 = vld [vmem:[#allocation24_spill] sm:$0xff] }
  0x75   :  { %v515_v28 = vsel %vm1329_vm5, %v1559_v14, %v1558_v6  ;;  %v516_v57 = vsel %vm1318_vm4, %v1561_v17, %v1560_v54  ;;  %v517_v55 = vsel %vm1329_vm5, %v1563_v32, %v1562_v20  ;;  %743 = vrsqrt.f32 %v1374_v16  ;;  %v745_v32 = vld [vmem:[#allocation8] sm:$0xff] }
  0x76   :  { %v522_v30 = vsel %vm1318_vm4, %v1136_v41, %v1138_v34  ;;  %v523_v21 = vsel %vm1329_vm5, %v1180_v38, %v1182_v42  ;;  %v1411_v26 = vsel %vm565_vm7, %v566_v18, %v564_v49  ;;  %v1415_v40 = vsel %vm577_vm9, %v578_v15, %v576_v39  ;;  %v1566_v42 = vld [vmem:[#allocation17_spill] sm:$0xff] }
  0x77   :  { %v616_v62 = vmul.f32 %v615_v61, %v1171_v22  ;;  %vm619_vm0 = vcmp.eq.f32.partialorder %v1171_v22, 0.0  ;;  %v620_v3 = vand.u32 2147483648, %v1171_v22  ;;  %v626_v41 = vsub.f32 1.5, %v625_v43 }
  0x78   :  { %v738_v34 = vpop.eup %737  ;;  %v524_v53 = vsub.f32 %v514_v13, %v1564_v60  ;;  %v525_v38 = vsub.f32 %v515_v28, %v1565_v4  ;;  %v526_v23 = vsub.f32 %v516_v57, %v1566_v42  ;;  %v527_v25 = vsub.f32 %v517_v55, %v1567_v9 }
  0x79   :  { %vm629_vm1 = vcmp.eq.f32.partialorder %v1235_v0, inf  ;;  %v740_v2 = vpop.eup %739  ;;  %v531_v63 = vmul.f32 %v738_v34, %v1359_v58  ;;  %v540_v35 = vand.u32 2147483648, %v1359_v58  ;;  %v652_v50 = vsub.f32 %v522_v30, %v510_v8  ;;  %v746_v30 = vld [vmem:[#allocation8 + $0x8] sm:$0xff] }
  0x7a   :  { %v653_v51 = vsub.f32 %v523_v21, %v511_v44  ;;  %v742_v11 = vpop.eup %741  ;;  %vm537_vm11 = vcmp.eq.f32.partialorder %v1359_v58, inf  ;;  %v543_v31 = vmul.f32 %v740_v2, %v1363_v24  ;;  %v552_v10 = vand.u32 2147483648, %v1363_v24 }
  0x7b   :  { %v594_v33 = vand.u32 2147483648, %v1368_v59  ;;  %v606_v52 = vand.u32 2147483648, %v1374_v16  ;;  %v744_v48 = vpop.eup %743  ;;  %v532_v56 = vmul.f32 %v738_v34, %v531_v63  ;;  %vm539_vm12 = vcmp.eq.f32.partialorder %v1359_v58, 0.0 }
  0x7c   :  { %vm549_vm13 = vcmp.eq.f32.partialorder %v1363_v24, inf  ;;  %v585_v29 = vmul.f32 %v742_v11, %v1368_v59  ;;  %v618_v27 = vsel %vm617_vm10, %v1171_v22, %v616_v62  ;;  %v627_v37 = vmul.f32 %v1278_v36, %v626_v41 }
  0x7d   :  { %v544_v46 = vmul.f32 %v740_v2, %v543_v31  ;;  %vm551_vm14 = vcmp.eq.f32.partialorder %v1363_v24, 0.0  ;;  %vm591_vm15 = vcmp.eq.f32.partialorder %v1368_v59, inf  ;;  %v597_v7 = vmul.f32 %v744_v48, %v1374_v16 }
  0x7e   :  { %vm631_vm2 = vcmp.eq.f32.partialorder %v1235_v0, 0.0  ;;  %v636_v18 = vmul.f32 %v524_v53, %v524_v53  ;;  %v533_v15 = vmul.f32 0.5, %v532_v56  ;;  %v586_v49 = vmul.f32 %v742_v11, %v585_v29 }
  0x7f   :  { %vm593_vm3 = vcmp.eq.f32.partialorder %v1368_v59, 0.0  ;;  %vm603_vm4 = vcmp.eq.f32.partialorder %v1374_v16, inf  ;;  %v654_v39 = vmul.f32 %v652_v50, %v652_v50  ;;  %v655_v61 = vmul.f32 %v653_v51, %v653_v51 }
  0x80   :  { %v545_v43 = vmul.f32 0.5, %v544_v46  ;;  %v598_v36 = vmul.f32 %v744_v48, %v597_v7  ;;  %vm605_vm5 = vcmp.eq.f32.partialorder %v1374_v16, 0.0  ;;  %v637_v8 = vmul.f32 %v525_v38, %v525_v38 }
  0x81   :  { %v638_v44 = vmul.f32 %v526_v23, %v526_v23  ;;  %v534_v19 = vsub.f32 1.5, %v533_v15  ;;  %v587_v5 = vmul.f32 0.5, %v586_v49  ;;  %v628_v13 = vmul.f32 %v627_v37, %v1235_v0 }
  0x82   :  { %v658_v6 = vadd.f32 %v1326_v12, %v1323_v45  ;;  %v546_v14 = vsub.f32 1.5, %v545_v43  ;;  %v599_v28 = vmul.f32 0.5, %v598_v36  ;;  %v639_v54 = vmul.f32 %v527_v25, %v527_v25 }
  0x83   :  { %v665_v17 = vadd.f32 %v1314_v47, %v1310_v1  ;;  %v535_v57 = vmul.f32 %v738_v34, %v534_v19  ;;  %v588_v20 = vsub.f32 1.5, %v587_v5  ;;  %v656_v55 = vmul.f32 %v745_v32, %v654_v39 }
  0x84   :  { %v657_v21 = vmul.f32 %v746_v30, %v655_v61  ;;  %v547_v62 = vmul.f32 %v740_v2, %v546_v14  ;;  %v600_v41 = vsub.f32 1.5, %v599_v28  ;;  %v621_v60 = vsel %vm619_vm0, %v620_v3, %v618_v27 }
  0x85   :  { %v632_v53 = vand.u32 2147483648, %v1235_v0  ;;  %v536_v45 = vmul.f32 %v535_v57, %v1359_v58  ;;  %v589_v12 = vmul.f32 %v742_v11, %v588_v20  ;;  %v630_v1 = vsel %vm629_vm1, %v1235_v0, %v628_v13 }
  0x86   :  { %v659_v47 = vrot.slane %v658_v6, 4  ;;  %v548_v34 = vmul.f32 %v547_v62, %v1363_v24  ;;  %v601_v4 = vmul.f32 %v744_v48, %v600_v41  ;;  %v640_v38 = vadd.f32 %v638_v44, %v636_v18 }
  0x87   :  { %v666_v42 = vrot.slane %v665_v17, 4  ;;  %v538_v22 = vsel %vm537_vm11, %v1359_v58, %v536_v45  ;;  %v590_v3 = vmul.f32 %v589_v12, %v1368_v59  ;;  %v641_v23 = vadd.f32 %v639_v54, %v637_v8 }
  0x88   :  { %v679_v9 = vadd.f32 %v657_v21, %v656_v55  ;;  %v541_v25 = vsel %vm539_vm12, %v540_v35, %v538_v22  ;;  %v550_v2 = vsel %vm549_vm13, %v1363_v24, %v548_v34  ;;  %v602_v63 = vmul.f32 %v601_v4, %v1374_v16 }
  0x89   :  { %v633_v50 = vsel %vm631_vm2, %v632_v53, %v630_v1  ;;  %v553_v51 = vsel %vm551_vm14, %v552_v10, %v550_v2  ;;  %v580_v11 = vsub.f32 %v541_v25, %v1411_v26  ;;  %v592_v31 = vsel %vm591_vm15, %v1368_v59, %v590_v3 }
  0x8a   :  { %v660_v58 = vadd.f32 %v659_v47, %v658_v6  ;;  %v581_v35 = vsub.f32 %v553_v51, %v1415_v40  ;;  %v595_v48 = vsel %vm593_vm3, %v594_v33, %v592_v31  ;;  %v604_v0 = vsel %vm603_vm4, %v1374_v16, %v602_v63 }
  0x8b   :  { %v667_v24 = vadd.f32 %v666_v42, %v665_v17  ;;  %v607_v26 = vsel %vm605_vm5, %v606_v52, %v604_v0  ;;  %v634_v10 = vsub.f32 %v595_v48, %v621_v60  ;;  %v642_v56 = vmul.f32 %v580_v11, %v580_v11 }
  0x8c   :  { %v680_v29 = vrot.slane %v679_v9, 4  ;;  %v635_v27 = vsub.f32 %v607_v26, %v633_v50  ;;  %v643_v40 = vmul.f32 %v581_v35, %v581_v35  ;;  %v661_v18 = vrot.slane %v660_v58, 2 }
  0x8d   :  { %v644_v37 = vadd.f32 %v642_v56, %v640_v38  ;;  %v646_v46 = vmul.f32 %v634_v10, %v634_v10  ;;  %v668_v15 = vrot.slane %v667_v24, 2  ;;  %vm686_vm6 = vcmask 1040384  }
  0x8e   :  { %v645_v7 = vadd.f32 %v643_v40, %v641_v23  ;;  %v647_v59 = vmul.f32 %v635_v27, %v635_v27  ;;  %v681_v49 = vadd.f32 %v680_v29, %v679_v9  ;;  %v662_v36 = vadd.f32 %v661_v18, %v660_v58 }
  0x8f   :  { %v648_v33 = vadd.f32 %v646_v46, %v644_v37  ;;  %v669_v8 = vadd.f32 %v668_v15, %v667_v24  ;;  %vm688_vm7 = vcmask 1041408   ;;  %vm690_vm8 = vcmask 1042432  }
  0x90   :  { %v649_v39 = vadd.f32 %v647_v59, %v645_v7  ;;  %v682_v16 = vrot.slane %v681_v49, 2  ;;  %v663_v19 = vrot.slane %v662_v36, 1  ;;  %vm692_vm9 = vcmask 1043456  }
  0x91   :  { %v650_v61 = vmul.f32 %v745_v32, %v648_v33  ;;  %v670_v5 = vrot.slane %v669_v8, 1 }
  0x92   :  { %v651_v43 = vmul.f32 %v746_v30, %v649_v39  ;;  %v683_v13 = vadd.f32 %v682_v16, %v681_v49  ;;  %v664_v28 = vadd.f32 %v663_v19, %v662_v36 }
  0x93   :  { %v671_v54 = vadd.f32 %v670_v5, %v669_v8 }
  0x94   :  { %v672_v52 = vadd.f32 %v651_v43, %v650_v61  ;;  %v684_v17 = vrot.slane %v683_v13, 1 }
  0x95   :  { %v687_v21 = vsel %vm686_vm6, %v664_v28, %v671_v54 }
  0x96   :  { %v673_v44 = vrot.slane %v672_v52, 4  ;;  %v685_v55 = vadd.f32 %v684_v17, %v683_v13 }
  0x98   :  { %v674_v6 = vadd.f32 %v673_v44, %v672_v52 }
  0x9a   :  { %v675_v14 = vrot.slane %v674_v6, 2 }
  0x9c   :  { %v676_v57 = vadd.f32 %v675_v14, %v674_v6 }
  0x9e   :  { %v677_v20 = vrot.slane %v676_v57, 1 }
  0xa0   :  { %v678_v32 = vadd.f32 %v677_v20, %v676_v57 }
  0xa2   :  { %v689_v30 = vsel %vm688_vm7, %v687_v21, %v678_v32 }
  0xa3   :  { %v691_v62 = vsel %vm690_vm8, %v689_v30, %v685_v55 }
  0xa4   :  { %v693_v41 = vsel %vm692_vm9, %v691_v62, 0.0 }
  0xa5   :  { %694 = vst [vmem:[#allocation10] sm:$0xff] %v693_v41 }
  0xa6   :  { %705 = dma.vmem_to_hbm [thread:$0]  %s701_s3, 128, %s703_s11, [#allocation4]  }
  0xa7   :  { %873 = dma.done.wait [#allocation4], 128  }
  0xa8   :  { %874 = vsyncadd [#allocation4], 4294967168 }
  0xa9   :  { %710 = vsyncpa [#allocation3], 1 }
  0xaa   :  { %711 = vsyncpa [#allocation6], 1 }
  0xab   :  { %712 = vsyncpa [#allocation9], 1 }
  0xac   :  { %713 = vsyncpa [#allocation4], 1 }

</bundles_post_ra>
